<compile_context>
chip_gen: v6e
topology: v6e:2x2x1
jax: 0.10.0
libtpu: 0.0.40
codegen_flags: <defaults>
</compile_context>

<pallas_src>
import functools

import jax
import jax.numpy as jnp
from jax.experimental import pallas as pl
from jax.experimental.pallas import tpu as pltpu


def _round_up(n, m):
    return ((n + m - 1) // m) * m


def _silu(x):
    # jax.nn.sigmoid lowers to logistic (EUP); math stays in f32.
    return x * jax.nn.sigmoid(x)


def mlp_kernel(x_ref,
               w1_ref, b1_ref,
               w2_ref, b2_ref,
               g_ref, beta_ref,
               w3_ref, b3_ref,
               w4_ref, b4_ref,
               w5_ref, b5_ref,
               o_ref,
               *, eps, inv_hidden, mxu_dtype):
    x = x_ref[...]

    def dense(h, w_ref, b_ref):
        # bf16 operand pack feeding the MXU; f32 accumulate; f32 bias add
        # (biases are already f32 — no extra cast).
        return (jnp.dot(h.astype(mxu_dtype), w_ref[...],
                        preferred_element_type=jnp.float32) + b_ref[...])

    # fc1 + SiLU, fc2 + SiLU
    h = _silu(dense(x, w1_ref, b1_ref))
    h = _silu(dense(h, w2_ref, b2_ref))

    # LayerNorm over last dim (f32; sums * precomputed 1/N, reuse centered).
    mean = jnp.sum(h, axis=-1, keepdims=True) * inv_hidden
    centered = h - mean
    var = jnp.sum(centered * centered, axis=-1, keepdims=True) * inv_hidden
    h = centered * jax.lax.rsqrt(var + eps) * g_ref[...] + beta_ref[...]

    # fc3 + dropout (identity @ eval) + SiLU
    h = _silu(dense(h, w3_ref, b3_ref))
    # fc4 + SiLU
    h = _silu(dense(h, w4_ref, b4_ref))
    # fc5 + dropout2 (identity @ eval) + sigmoid
    h = jax.nn.sigmoid(dense(h, w5_ref, b5_ref))

    o_ref[...] = h.astype(o_ref.dtype)


@functools.lru_cache(maxsize=1)
def _buffered_single_ok():
    """Narrow feature probe: does this Pallas build support
    pipeline_mode=pl.Buffered(1) on a grid-invariant BlockSpec?  The probe
    compiles/runs a trivial kernel so failures here never mask errors from
    the real MLP kernel."""
    if not hasattr(pl, "Buffered"):
        return False

    def _k(c_ref, x_ref, o_ref):
        o_ref[...] = x_ref[...] + c_ref[...]

    try:
        const = pl.BlockSpec((8, 128), lambda i: (0, 0),
                             pipeline_mode=pl.Buffered(1))
        fn = pl.pallas_call(
            _k,
            out_shape=jax.ShapeDtypeStruct((8, 128), jnp.float32),
            grid=(1,),
            in_specs=[const, pl.BlockSpec((8, 128), lambda i: (i, 0))],
            out_specs=pl.BlockSpec((8, 128), lambda i: (i, 0)))
        jax.block_until_ready(fn(jnp.zeros((8, 128), jnp.float32),
                                 jnp.zeros((8, 128), jnp.float32)))
        return True
    except Exception:
        return False


def _vmem_capacity_bytes(default=64 << 20):
    """Physical VMEM per core (128 MiB v5e/v6e, 64 MiB per TC on v7x)."""
    try:
        cap = getattr(pltpu.get_tpu_info(), "vmem_capacity_bytes", None)
        if cap:
            return int(cap)
    except Exception:
        pass
    return default


def mlp_forward(x, params, *, eps=1e-5, block_b=None, mxu_dtype=jnp.bfloat16):
    B, in_dim = x.shape
    out_dim = params["w5"].shape[1]
    hidden_dim1 = params["gamma"].shape[-1]

    # --- batch tiling: no padding copy of x; ragged last block is clipped by
    # Pallas.  Aim for >= 4 grid steps (v7x: 2 TCs x >=2 pipelined iters each)
    # while keeping blocks fat enough to amortize ~0.35us/step overhead.
    if block_b is None:
        block_b = min(2048, max(8, _round_up(pl.cdiv(B, 4), 8)))
    block_b = max(8, _round_up(block_b, 8))
    block_b = min(block_b, _round_up(B, 8))

    use_buffered = _buffered_single_ok()

    wcast = lambda w: w.astype(mxu_dtype)
    ordered = [
        wcast(params["w1"]), params["b1"],
        wcast(params["w2"]), params["b2"],
        params["gamma"], params["beta"],
        wcast(params["w3"]), params["b3"],
        wcast(params["w4"]), params["b4"],
        wcast(params["w5"]), params["b5"],
    ]

    # --- generation-aware VMEM budget: weights resident, x/out double-buffered.
    vmem_cap = int(0.75 * _vmem_capacity_bytes())
    nbytes = lambda a: a.size * jnp.dtype(a.dtype).itemsize
    weight_bytes = sum(nbytes(a) for a in ordered)
    weight_factor = 1 if use_buffered else 2
    max_feat = max([a.shape[-1] for a in ordered] + [in_dim, out_dim])

    def vmem_need(blk):
        io = 2 * blk * (in_dim + out_dim) * 4      # double-buffered x / out
        act = 8 * blk * max_feat * 4               # live f32 activations
        return weight_factor * weight_bytes + io + act

    # Shrink the batch tile deliberately if the resident-weight plan would not
    # fit (matters on v7x's 64 MiB VMEM for big hidden dims).
    while block_b > 8 and vmem_need(block_b) > vmem_cap:
        block_b = max(8, _round_up(block_b // 2, 8))

    grid = (pl.cdiv(B, block_b),)
    vmem_limit = int(max(min(2 * vmem_need(block_b), vmem_cap),
                         min(32 << 20, vmem_cap)))

    kernel = functools.partial(mlp_kernel, eps=eps,
                               inv_hidden=1.0 / hidden_dim1,
                               mxu_dtype=mxu_dtype)

    def const_spec(arr):
        idx = lambda i, nd=arr.ndim: (0,) * nd
        if use_buffered:
            # Grid-invariant block: single-buffered, resident across steps.
            return pl.BlockSpec(arr.shape, idx, pipeline_mode=pl.Buffered(1))
        return pl.BlockSpec(arr.shape, idx)

    in_specs = [pl.BlockSpec((block_b, in_dim), lambda i: (i, 0))]
    in_specs += [const_spec(a) for a in ordered]

    return pl.pallas_call(
        kernel,
        out_shape=jax.ShapeDtypeStruct((B, out_dim), jnp.float32),
        grid=grid,
        in_specs=in_specs,
        out_specs=pl.BlockSpec((block_b, out_dim), lambda i: (i, 0)),
        compiler_params=pltpu.CompilerParams(
            dimension_semantics=("parallel",),
            vmem_limit_bytes=vmem_limit),
    )(x, *ordered)


def init_params(key, input_dim, hidden_dim, hidden_dim1, hidden_dim2,
                hidden_dim3, output_dim):
    """Deterministic init mimicking nn.Linear (uniform +/- 1/sqrt(fan_in))."""
    dims = [(input_dim, hidden_dim), (hidden_dim, hidden_dim1),
            (hidden_dim1, hidden_dim2), (hidden_dim2, hidden_dim3),
            (hidden_dim3, output_dim)]
    params = {}
    for idx, (fan_in, fan_out) in enumerate(dims, start=1):
        key, kw, kb = jax.random.split(key, 3)
        bound = 1.0 / (fan_in ** 0.5)
        params[f"w{idx}"] = jax.random.uniform(
            kw, (fan_in, fan_out), jnp.float32, -bound, bound)
        params[f"b{idx}"] = jax.random.uniform(
            kb, (1, fan_out), jnp.float32, -bound, bound)
    params["gamma"] = jnp.ones((1, hidden_dim1), jnp.float32)
    params["beta"] = jnp.zeros((1, hidden_dim1), jnp.float32)
    return params


def mlp_reference(x, params, eps=1e-5, mxu_dtype=None):
    """Pure-JAX reference; if mxu_dtype is set, emulates the kernel's bf16
    matmul operands (f32 accumulate / f32 elementwise)."""
    def dense(h, w, b):
        if mxu_dtype is not None:
            h = h.astype(mxu_dtype)
            w = w.astype(mxu_dtype)
        return jnp.dot(h, w, preferred_element_type=jnp.float32) + b

    silu = lambda v: v * jax.nn.sigmoid(v)
    h = silu(dense(x, params["w1"], params["b1"]))
    h = silu(dense(h, params["w2"], params["b2"]))
    mu = h.mean(-1, keepdims=True)
    var = ((h - mu) ** 2).mean(-1, keepdims=True)
    h = (h - mu) * jax.lax.rsqrt(var + eps) * params["gamma"] + params["beta"]
    h = silu(dense(h, params["w3"], params["b3"]))
    h = silu(dense(h, params["w4"], params["b4"]))
    h = dense(h, params["w5"], params["b5"])
    return jax.nn.sigmoid(h)


if __name__ == "__main__":
    input_dim, hidden_dim, hidden_dim1 = 16, 32, 32
    hidden_dim2, hidden_dim3, output_dim = 32, 32, 8
    batch = 256   # default block_b -> 64 rows, 4 grid steps

    key = jax.random.PRNGKey(0)
    key, kx = jax.random.split(key)
    x = jax.random.normal(kx, (batch, input_dim), jnp.float32)
    params = init_params(key, input_dim, hidden_dim, hidden_dim1,
                         hidden_dim2, hidden_dim3, output_dim)

    out = jax.block_until_ready(mlp_forward(x, params))
    assert out.shape == (batch, output_dim)

    # Tight check against a reference emulating the bf16 MXU operands.
    ref_bf16 = mlp_reference(x, params, mxu_dtype=jnp.bfloat16)
    assert jnp.allclose(out, ref_bf16, atol=1e-2, rtol=1e-2)
    # Loose check against the full-f32 reference (bf16 operands => ~1e-2 err).
    ref_f32 = mlp_reference(x, params)
    assert jnp.allclose(out, ref_f32, atol=3e-2, rtol=0)

    # Ragged batch: grid = cdiv(B, block_b), last block clipped in-kernel
    # (no wrapper-side pad copy of x).
    x_ragged = x[:250]
    out_r = jax.block_until_ready(mlp_forward(x_ragged, params, block_b=64))
    assert out_r.shape == (250, output_dim)
    assert jnp.allclose(out_r, ref_bf16[:250], atol=1e-2, rtol=1e-2)

    print("KERNEL_OK")
</pallas_src>

<mosaic_0001>
module attributes {stable_mosaic.version = 11 : i64} {
  func.func @_k(%arg0: i32, %arg1: memref<8x128xf32, #tpu.memory_space<vmem>>, %arg2: memref<8x128xf32, #tpu.memory_space<vmem>>, %arg3: memref<8x128xf32, #tpu.memory_space<vmem>>) attributes {dimension_semantics = [#tpu.dimension_semantics<arbitrary>], iteration_bounds = array<i64: 1>, scalar_prefetch = 0 : i64, scratch_operands = 0 : i64, tpu.core_type = #tpu.core_type<tc>, window_params = [{pipeline_mode = #tpu.pipeline_mode<synchronous>, transform_indices = @transform_0, window_bounds = array<i64: 8, 128>}, {transform_indices = @transform_1, window_bounds = array<i64: 8, 128>}, {transform_indices = @transform_2, window_bounds = array<i64: 8, 128>}]} {
    %c0 = arith.constant 0 : index
    %c0_0 = arith.constant 0 : index
    %0 = vector.load %arg2[%c0, %c0_0] : memref<8x128xf32, #tpu.memory_space<vmem>>, vector<8x128xf32>
    %c0_1 = arith.constant 0 : index
    %c0_2 = arith.constant 0 : index
    %1 = vector.load %arg1[%c0_1, %c0_2] : memref<8x128xf32, #tpu.memory_space<vmem>>, vector<8x128xf32>
    %2 = arith.addf %0, %1 : vector<8x128xf32>
    %c0_3 = arith.constant 0 : index
    %c0_4 = arith.constant 0 : index
    %3 = vector.load %arg3[%c0_3, %c0_4] : memref<8x128xf32, #tpu.memory_space<vmem>>, vector<8x128xf32>
    tpu.vector_store %arg3[%c0_3, %c0_4], %2 {strides = array<i32>} : memref<8x128xf32, #tpu.memory_space<vmem>>, vector<8x128xf32>,
    return
  }
  func.func @transform_0(%arg0: i32) -> (i32, i32) {
    %c0_i32 = arith.constant 0 : i32
    %c0_i32_0 = arith.constant 0 : i32
    %c0_i32_1 = arith.constant 0 : i32
    return %c0_i32, %c0_i32_0 : i32, i32
  }
  func.func @transform_1(%arg0: i32) -> (i32, i32) {
    %c0_i32 = arith.constant 0 : i32
    %c0_i32_0 = arith.constant 0 : i32
    return %arg0, %c0_i32 : i32, i32
  }
  func.func @transform_2(%arg0: i32) -> (i32, i32) {
    %c0_i32 = arith.constant 0 : i32
    %c0_i32_0 = arith.constant 0 : i32
    return %arg0, %c0_i32 : i32, i32
  }
}

module attributes {stable_mosaic.version = 11 : i64} {
  func.func @mlp_kernel(%arg0: i32, %arg1: memref<64x16xf32, #tpu.memory_space<vmem>>, %arg2: memref<16x32xbf16, #tpu.memory_space<vmem>>, %arg3: memref<1x32xf32, #tpu.memory_space<vmem>>, %arg4: memref<32x32xbf16, #tpu.memory_space<vmem>>, %arg5: memref<1x32xf32, #tpu.memory_space<vmem>>, %arg6: memref<1x32xf32, #tpu.memory_space<vmem>>, %arg7: memref<1x32xf32, #tpu.memory_space<vmem>>, %arg8: memref<32x32xbf16, #tpu.memory_space<vmem>>, %arg9: memref<1x32xf32, #tpu.memory_space<vmem>>, %arg10: memref<32x32xbf16, #tpu.memory_space<vmem>>, %arg11: memref<1x32xf32, #tpu.memory_space<vmem>>, %arg12: memref<32x8xbf16, #tpu.memory_space<vmem>>, %arg13: memref<1x8xf32, #tpu.memory_space<vmem>>, %arg14: memref<64x8xf32, #tpu.memory_space<vmem>>) attributes {dimension_semantics = [#tpu.dimension_semantics<parallel>], iteration_bounds = array<i64: 4>, scalar_prefetch = 0 : i64, scratch_operands = 0 : i64, tpu.core_type = #tpu.core_type<tc>, window_params = [{transform_indices = @transform_0, window_bounds = array<i64: 64, 16>}, {pipeline_mode = #tpu.pipeline_mode<synchronous>, transform_indices = @transform_1, window_bounds = array<i64: 16, 32>}, {pipeline_mode = #tpu.pipeline_mode<synchronous>, transform_indices = @transform_2, window_bounds = array<i64: 1, 32>}, {pipeline_mode = #tpu.pipeline_mode<synchronous>, transform_indices = @transform_3, window_bounds = array<i64: 32, 32>}, {pipeline_mode = #tpu.pipeline_mode<synchronous>, transform_indices = @transform_4, window_bounds = array<i64: 1, 32>}, {pipeline_mode = #tpu.pipeline_mode<synchronous>, transform_indices = @transform_5, window_bounds = array<i64: 1, 32>}, {pipeline_mode = #tpu.pipeline_mode<synchronous>, transform_indices = @transform_6, window_bounds = array<i64: 1, 32>}, {pipeline_mode = #tpu.pipeline_mode<synchronous>, transform_indices = @transform_7, window_bounds = array<i64: 32, 32>}, {pipeline_mode = #tpu.pipeline_mode<synchronous>, transform_indices = @transform_8, window_bounds = array<i64: 1, 32>}, {pipeline_mode = #tpu.pipeline_mode<synchronous>, transform_indices = @transform_9, window_bounds = array<i64: 32, 32>}, {pipeline_mode = #tpu.pipeline_mode<synchronous>, transform_indices = @transform_10, window_bounds = array<i64: 1, 32>}, {pipeline_mode = #tpu.pipeline_mode<synchronous>, transform_indices = @transform_11, window_bounds = array<i64: 32, 8>}, {pipeline_mode = #tpu.pipeline_mode<synchronous>, transform_indices = @transform_12, window_bounds = array<i64: 1, 8>}, {transform_indices = @transform_13, window_bounds = array<i64: 64, 8>}]} {
    %c0 = arith.constant 0 : index
    %c0_0 = arith.constant 0 : index
    %0 = vector.load %arg1[%c0, %c0_0] : memref<64x16xf32, #tpu.memory_space<vmem>>, vector<64x16xf32>
    %1 = arith.truncf %0 : vector<64x16xf32> to vector<64x16xbf16>
    %c0_1 = arith.constant 0 : index
    %c0_2 = arith.constant 0 : index
    %2 = vector.load %arg2[%c0_1, %c0_2] : memref<16x32xbf16, #tpu.memory_space<vmem>>, vector<16x32xbf16>
    %cst = arith.constant dense<0.000000e+00> : vector<64x32xf32>
    %3 = tpu.matmul %1, %2, %cst {dimension_numbers = #tpu.dot_dimension_numbers<[1], [0], [0], [1], [0, 0, 1, 1], [], []>} : vector<64x16xbf16>, vector<16x32xbf16>, vector<64x32xf32> -> vector<64x32xf32>
    %c0_3 = arith.constant 0 : index
    %c0_4 = arith.constant 0 : index
    %4 = vector.load %arg3[%c0_3, %c0_4] : memref<1x32xf32, #tpu.memory_space<vmem>>, vector<1x32xf32>
    %5 = vector.broadcast %4 : vector<1x32xf32> to vector<64x32xf32>
    %6 = arith.addf %3, %5 : vector<64x32xf32>
    %7 = arith.negf %6 : vector<64x32xf32>
    %8 = math.exp %7 : vector<64x32xf32>
    %cst_5 = arith.constant 1.000000e+00 : f32
    %9 = vector.broadcast %cst_5 : f32 to vector<64x32xf32>
    %10 = arith.addf %9, %8 : vector<64x32xf32>
    %11 = arith.divf %9, %10 : vector<64x32xf32>
    %12 = arith.mulf %6, %11 : vector<64x32xf32>
    %13 = arith.truncf %12 : vector<64x32xf32> to vector<64x32xbf16>
    %c0_6 = arith.constant 0 : index
    %c0_7 = arith.constant 0 : index
    %14 = vector.load %arg4[%c0_6, %c0_7] : memref<32x32xbf16, #tpu.memory_space<vmem>>, vector<32x32xbf16>
    %cst_8 = arith.constant dense<0.000000e+00> : vector<64x32xf32>
    %15 = tpu.matmul %13, %14, %cst_8 {dimension_numbers = #tpu.dot_dimension_numbers<[1], [0], [0], [1], [0, 0, 1, 1], [], []>} : vector<64x32xbf16>, vector<32x32xbf16>, vector<64x32xf32> -> vector<64x32xf32>
    %c0_9 = arith.constant 0 : index
    %c0_10 = arith.constant 0 : index
    %16 = vector.load %arg5[%c0_9, %c0_10] : memref<1x32xf32, #tpu.memory_space<vmem>>, vector<1x32xf32>
    %17 = vector.broadcast %16 : vector<1x32xf32> to vector<64x32xf32>
    %18 = arith.addf %15, %17 : vector<64x32xf32>
    %19 = arith.negf %18 : vector<64x32xf32>
    %20 = math.exp %19 : vector<64x32xf32>
    %cst_11 = arith.constant 1.000000e+00 : f32
    %21 = vector.broadcast %cst_11 : f32 to vector<64x32xf32>
    %22 = arith.addf %21, %20 : vector<64x32xf32>
    %23 = arith.divf %21, %22 : vector<64x32xf32>
    %24 = arith.mulf %18, %23 : vector<64x32xf32>
    %cst_12 = arith.constant dense<0.000000e+00> : vector<64xf32>
    %25 = vector.multi_reduction <add>, %24, %cst_12 [1] : vector<64x32xf32> to vector<64xf32>
    %26 = vector.shape_cast %25 : vector<64xf32> to vector<64x1xf32>
    %cst_13 = arith.constant 3.125000e-02 : f32
    %27 = vector.broadcast %cst_13 : f32 to vector<64x1xf32>
    %28 = arith.mulf %26, %27 : vector<64x1xf32>
    %29 = vector.broadcast %28 : vector<64x1xf32> to vector<64x32xf32>
    %30 = arith.subf %24, %29 : vector<64x32xf32>
    %31 = arith.mulf %30, %30 : vector<64x32xf32>
    %cst_14 = arith.constant dense<0.000000e+00> : vector<64xf32>
    %32 = vector.multi_reduction <add>, %31, %cst_14 [1] : vector<64x32xf32> to vector<64xf32>
    %33 = vector.shape_cast %32 : vector<64xf32> to vector<64x1xf32>
    %cst_15 = arith.constant 3.125000e-02 : f32
    %34 = vector.broadcast %cst_15 : f32 to vector<64x1xf32>
    %35 = arith.mulf %33, %34 : vector<64x1xf32>
    %cst_16 = arith.constant 9.99999974E-6 : f32
    %36 = vector.broadcast %cst_16 : f32 to vector<64x1xf32>
    %37 = arith.addf %35, %36 : vector<64x1xf32>
    %38 = math.rsqrt %37 : vector<64x1xf32>
    %39 = vector.broadcast %38 : vector<64x1xf32> to vector<64x32xf32>
    %40 = arith.mulf %30, %39 : vector<64x32xf32>
    %c0_17 = arith.constant 0 : index
    %c0_18 = arith.constant 0 : index
    %41 = vector.load %arg6[%c0_17, %c0_18] : memref<1x32xf32, #tpu.memory_space<vmem>>, vector<1x32xf32>
    %42 = vector.broadcast %41 : vector<1x32xf32> to vector<64x32xf32>
    %43 = arith.mulf %40, %42 : vector<64x32xf32>
    %c0_19 = arith.constant 0 : index
    %c0_20 = arith.constant 0 : index
    %44 = vector.load %arg7[%c0_19, %c0_20] : memref<1x32xf32, #tpu.memory_space<vmem>>, vector<1x32xf32>
    %45 = vector.broadcast %44 : vector<1x32xf32> to vector<64x32xf32>
    %46 = arith.addf %43, %45 : vector<64x32xf32>
    %47 = arith.truncf %46 : vector<64x32xf32> to vector<64x32xbf16>
    %c0_21 = arith.constant 0 : index
    %c0_22 = arith.constant 0 : index
    %48 = vector.load %arg8[%c0_21, %c0_22] : memref<32x32xbf16, #tpu.memory_space<vmem>>, vector<32x32xbf16>
    %cst_23 = arith.constant dense<0.000000e+00> : vector<64x32xf32>
    %49 = tpu.matmul %47, %48, %cst_23 {dimension_numbers = #tpu.dot_dimension_numbers<[1], [0], [0], [1], [0, 0, 1, 1], [], []>} : vector<64x32xbf16>, vector<32x32xbf16>, vector<64x32xf32> -> vector<64x32xf32>
    %c0_24 = arith.constant 0 : index
    %c0_25 = arith.constant 0 : index
    %50 = vector.load %arg9[%c0_24, %c0_25] : memref<1x32xf32, #tpu.memory_space<vmem>>, vector<1x32xf32>
    %51 = vector.broadcast %50 : vector<1x32xf32> to vector<64x32xf32>
    %52 = arith.addf %49, %51 : vector<64x32xf32>
    %53 = arith.negf %52 : vector<64x32xf32>
    %54 = math.exp %53 : vector<64x32xf32>
    %cst_26 = arith.constant 1.000000e+00 : f32
    %55 = vector.broadcast %cst_26 : f32 to vector<64x32xf32>
    %56 = arith.addf %55, %54 : vector<64x32xf32>
    %57 = arith.divf %55, %56 : vector<64x32xf32>
    %58 = arith.mulf %52, %57 : vector<64x32xf32>
    %59 = arith.truncf %58 : vector<64x32xf32> to vector<64x32xbf16>
    %c0_27 = arith.constant 0 : index
    %c0_28 = arith.constant 0 : index
    %60 = vector.load %arg10[%c0_27, %c0_28] : memref<32x32xbf16, #tpu.memory_space<vmem>>, vector<32x32xbf16>
    %cst_29 = arith.constant dense<0.000000e+00> : vector<64x32xf32>
    %61 = tpu.matmul %59, %60, %cst_29 {dimension_numbers = #tpu.dot_dimension_numbers<[1], [0], [0], [1], [0, 0, 1, 1], [], []>} : vector<64x32xbf16>, vector<32x32xbf16>, vector<64x32xf32> -> vector<64x32xf32>
    %c0_30 = arith.constant 0 : index
    %c0_31 = arith.constant 0 : index
    %62 = vector.load %arg11[%c0_30, %c0_31] : memref<1x32xf32, #tpu.memory_space<vmem>>, vector<1x32xf32>
    %63 = vector.broadcast %62 : vector<1x32xf32> to vector<64x32xf32>
    %64 = arith.addf %61, %63 : vector<64x32xf32>
    %65 = arith.negf %64 : vector<64x32xf32>
    %66 = math.exp %65 : vector<64x32xf32>
    %cst_32 = arith.constant 1.000000e+00 : f32
    %67 = vector.broadcast %cst_32 : f32 to vector<64x32xf32>
    %68 = arith.addf %67, %66 : vector<64x32xf32>
    %69 = arith.divf %67, %68 : vector<64x32xf32>
    %70 = arith.mulf %64, %69 : vector<64x32xf32>
    %71 = arith.truncf %70 : vector<64x32xf32> to vector<64x32xbf16>
    %c0_33 = arith.constant 0 : index
    %c0_34 = arith.constant 0 : index
    %72 = vector.load %arg12[%c0_33, %c0_34] : memref<32x8xbf16, #tpu.memory_space<vmem>>, vector<32x8xbf16>
    %cst_35 = arith.constant dense<0.000000e+00> : vector<64x8xf32>
    %73 = tpu.matmul %71, %72, %cst_35 {dimension_numbers = #tpu.dot_dimension_numbers<[1], [0], [0], [1], [0, 0, 1, 1], [], []>} : vector<64x32xbf16>, vector<32x8xbf16>, vector<64x8xf32> -> vector<64x8xf32>
    %c0_36 = arith.constant 0 : index
    %c0_37 = arith.constant 0 : index
    %74 = vector.load %arg13[%c0_36, %c0_37] : memref<1x8xf32, #tpu.memory_space<vmem>>, vector<1x8xf32>
    %75 = vector.broadcast %74 : vector<1x8xf32> to vector<64x8xf32>
    %76 = arith.addf %73, %75 : vector<64x8xf32>
    %77 = arith.negf %76 : vector<64x8xf32>
    %78 = math.exp %77 : vector<64x8xf32>
    %cst_38 = arith.constant 1.000000e+00 : f32
    %79 = vector.broadcast %cst_38 : f32 to vector<64x8xf32>
    %80 = arith.addf %79, %78 : vector<64x8xf32>
    %81 = arith.divf %79, %80 : vector<64x8xf32>
    %c0_39 = arith.constant 0 : index
    %c0_40 = arith.constant 0 : index
    %82 = vector.load %arg14[%c0_39, %c0_40] : memref<64x8xf32, #tpu.memory_space<vmem>>, vector<64x8xf32>
    tpu.vector_store %arg14[%c0_39, %c0_40], %81 {strides = array<i32>} : memref<64x8xf32, #tpu.memory_space<vmem>>, vector<64x8xf32>,
    return
  }
  func.func @transform_0(%arg0: i32) -> (i32, i32) {
    %c0_i32 = arith.constant 0 : i32
    %c0_i32_0 = arith.constant 0 : i32
    return %arg0, %c0_i32 : i32, i32
  }
  func.func @transform_1(%arg0: i32) -> (i32, i32) {
    %c0_i32 = arith.constant 0 : i32
    %c0_i32_0 = arith.constant 0 : i32
    %c0_i32_1 = arith.constant 0 : i32
    return %c0_i32, %c0_i32_0 : i32, i32
  }
  func.func @transform_2(%arg0: i32) -> (i32, i32) {
    %c0_i32 = arith.constant 0 : i32
    %c0_i32_0 = arith.constant 0 : i32
    %c0_i32_1 = arith.constant 0 : i32
    return %c0_i32, %c0_i32_0 : i32, i32
  }
  func.func @transform_3(%arg0: i32) -> (i32, i32) {
    %c0_i32 = arith.constant 0 : i32
    %c0_i32_0 = arith.constant 0 : i32
    %c0_i32_1 = arith.constant 0 : i32
    return %c0_i32, %c0_i32_0 : i32, i32
  }
  func.func @transform_4(%arg0: i32) -> (i32, i32) {
    %c0_i32 = arith.constant 0 : i32
    %c0_i32_0 = arith.constant 0 : i32
    %c0_i32_1 = arith.constant 0 : i32
    return %c0_i32, %c0_i32_0 : i32, i32
  }
  func.func @transform_5(%arg0: i32) -> (i32, i32) {
    %c0_i32 = arith.constant 0 : i32
    %c0_i32_0 = arith.constant 0 : i32
    %c0_i32_1 = arith.constant 0 : i32
    return %c0_i32, %c0_i32_0 : i32, i32
  }
  func.func @transform_6(%arg0: i32) -> (i32, i32) {
    %c0_i32 = arith.constant 0 : i32
    %c0_i32_0 = arith.constant 0 : i32
    %c0_i32_1 = arith.constant 0 : i32
    return %c0_i32, %c0_i32_0 : i32, i32
  }
  func.func @transform_7(%arg0: i32) -> (i32, i32) {
    %c0_i32 = arith.constant 0 : i32
    %c0_i32_0 = arith.constant 0 : i32
    %c0_i32_1 = arith.constant 0 : i32
    return %c0_i32, %c0_i32_0 : i32, i32
  }
  func.func @transform_8(%arg0: i32) -> (i32, i32) {
    %c0_i32 = arith.constant 0 : i32
    %c0_i32_0 = arith.constant 0 : i32
    %c0_i32_1 = arith.constant 0 : i32
    return %c0_i32, %c0_i32_0 : i32, i32
  }
  func.func @transform_9(%arg0: i32) -> (i32, i32) {
    %c0_i32 = arith.constant 0 : i32
    %c0_i32_0 = arith.constant 0 : i32
    %c0_i32_1 = arith.constant 0 : i32
    return %c0_i32, %c0_i32_0 : i32, i32
  }
  func.func @transform_10(%arg0: i32) -> (i32, i32) {
    %c0_i32 = arith.constant 0 : i32
    %c0_i32_0 = arith.constant 0 : i32
    %c0_i32_1 = arith.constant 0 : i32
    return %c0_i32, %c0_i32_0 : i32, i32
  }
  func.func @transform_11(%arg0: i32) -> (i32, i32) {
    %c0_i32 = arith.constant 0 : i32
    %c0_i32_0 = arith.constant 0 : i32
    %c0_i32_1 = arith.constant 0 : i32
    return %c0_i32, %c0_i32_0 : i32, i32
  }
  func.func @transform_12(%arg0: i32) -> (i32, i32) {
    %c0_i32 = arith.constant 0 : i32
    %c0_i32_0 = arith.constant 0 : i32
    %c0_i32_1 = arith.constant 0 : i32
    return %c0_i32, %c0_i32_0 : i32, i32
  }
  func.func @transform_13(%arg0: i32) -> (i32, i32) {
    %c0_i32 = arith.constant 0 : i32
    %c0_i32_0 = arith.constant 0 : i32
    return %arg0, %c0_i32 : i32, i32
  }
}

</mosaic_0001>

<bundles_post_ra>
// kernel: tpu_custom_call.1
= control target key start
LH: loop header
LB: loop body
LE: loop exit
PB: predicated region body
PF: predicated region fallthrough
CT: control target
= control target key end

     0   :  { %7 = vsyncpa [#allocation3], 0  ;;  %s152_s0 = inlined_call_operand.hbm [shape: f32[8,128], index: 0, kind: input, shape index: {}]   ;;  %s153_s1 = inlined_call_operand.hbm [shape: f32[8,128], index: 1, kind: input, shape index: {}]   ;;  %s154_s2 = inlined_call_operand.hbm [shape: f32[8,128], index: 2, kind: output, shape index: {}]  }
   0x1   :  { %8 = vsyncpa [#allocation6], 0 }
   0x2   :  { %9 = vsyncpa [#allocation4], 0  ;;  %s125_s9 = smov [#allocation2]   ;;  %s126_s11 = smov [#allocation5]  }
   0x3   :  { %s16_s10 = sshll.u32 %s125_s9, 4  ;;  %s26_s12 = sshll.u32 %s126_s11, 4  ;;  %s17_s10 = int_to_ptr.vmem [resolvable:$true] %s16_s10  ;;  %s27_s12 = int_to_ptr.vmem [resolvable:$true] %s26_s12 }
   0x4   :  { %s67_s13 = scalar_lea.vmem %s17_s10, 128  ;;  %p72_p1 = scmp.lt.s32.totalorder %s17_s10, %s17_s10 }
   0x5   :  { %p68_p0 = scmp.ne.s32.totalorder %s17_s10, %s67_s13  ;;  %p73_p2 = scmp.lt.s32.totalorder %s67_s13, %s67_s13 }
   0x7   :  { %p74_p3 = por %p73_p2, %p72_p1 }
   0x9   :  { %p75_p4 = pnand %p74_p3, %p68_p0 }
   0xb   :  { %78 = shalt.err (!%p75_p4)
}
   0xc   :  { %19 = dma.hbm_to_vmem [thread:$0]  %s152_s0, 128, %s17_s10, [#allocation3]  }
   0xd   :  { %s87_s16 = scalar_lea.vmem %s27_s12, 128  ;;  %p92_p6 = scmp.lt.s32.totalorder %s27_s12, %s27_s12 }
   0xe   :  { %p88_p5 = scmp.ne.s32.totalorder %s27_s12, %s87_s16  ;;  %p93_p7 = scmp.lt.s32.totalorder %s87_s16, %s87_s16 }
  0x10   :  { %p94_p8 = por %p93_p7, %p92_p6 }
  0x12   :  { %p95_p9 = pnand %p94_p8, %p88_p5 }
  0x14   :  { %98 = shalt.err (!%p95_p9)
}
  0x15   :  { %29 = dma.hbm_to_vmem [thread:$0]  %s153_s1, 128, %s27_s12, [#allocation6]  }
  0x16   :  { %119 = dma.done.wait [#allocation3], 128  }
  0x17   :  { %120 = vsyncadd [#allocation3], 4294967168 }
  0x18   :  { %121 = dma.done.wait [#allocation6], 128  }
  0x19   :  { %122 = vsyncadd [#allocation6], 4294967168  ;;  %s127_s19 = smov [#allocation7]   ;;  %v36_v0 = vld [vmem:[#allocation5] sm:$0xff]  ;;  %v37_v1 = vld [vmem:[#allocation2] sm:$0xff] }
  0x1a   :  { %s46_s20 = sshll.u32 %s127_s19, 4  ;;  %v38_v2 = vadd.f32 %v37_v1, %v36_v0  ;;  %s47_s20 = int_to_ptr.vmem [resolvable:$true] %s46_s20 }
  0x1b   :  { %s99_s0 = scalar_lea.vmem %s47_s20, 128  ;;  %p104_p11 = scmp.lt.s32.totalorder %s47_s20, %s47_s20 }
  0x1c   :  { %39 = vst [vmem:[#allocation7] sm:$0xff] %v38_v2  ;;  %p100_p10 = scmp.ne.s32.totalorder %s47_s20, %s99_s0  ;;  %p105_p12 = scmp.lt.s32.totalorder %s99_s0, %s99_s0 }
  0x1e   :  { %p106_p13 = por %p105_p12, %p104_p11 }
  0x20   :  { %p107_p0 = pnand %p106_p13, %p100_p10 }
  0x22   :  { %110 = shalt.err (!%p107_p0)
}
  0x23   :  { %49 = dma.vmem_to_hbm [thread:$0]  %s47_s20, 128, %s154_s2, [#allocation4]  }
  0x24   :  { %123 = dma.done.wait [#allocation4], 128  }
  0x25   :  { %124 = vsyncadd [#allocation4], 4294967168 }
  0x26   :  { %53 = vsyncpa [#allocation3], 1 }
  0x27   :  { %54 = vsyncpa [#allocation6], 1 }
  0x28   :  { %55 = vsyncpa [#allocation4], 1 }

// kernel: tpu_custom_call.1
= control target key start
LH: loop header
LB: loop body
LE: loop exit
PB: predicated region body
PF: predicated region fallthrough
CT: control target
= control target key end

     0   :  { %s1885_s25 = smov 0   ;;  %s2045_s0 = inlined_call_operand.vmem [shape: f32[256,16], index: 0, kind: input, shape index: {}]   ;;  %s2046_s1 = inlined_call_operand.vmem [shape: bf16[16,32], index: 1, kind: input, shape index: {}]   ;;  %s2047_s2 = inlined_call_operand.vmem [shape: f32[1,32], index: 2, kind: input, shape index: {}]   ;;  %s2048_s3 = inlined_call_operand.vmem [shape: bf16[32,32], index: 3, kind: input, shape index: {}]   ;;  %s2049_s4 = inlined_call_operand.vmem [shape: f32[1,32], index: 4, kind: input, shape index: {}]   ;;  %s2050_s5 = inlined_call_operand.vmem [shape: f32[1,32], index: 5, kind: input, shape index: {}]   ;;  %s2051_s6 = inlined_call_operand.vmem [shape: f32[1,32], index: 6, kind: input, shape index: {}]   ;;  %s2052_s7 = inlined_call_operand.vmem [shape: bf16[32,32], index: 7, kind: input, shape index: {}]   ;;  %s2053_s8 = inlined_call_operand.vmem [shape: f32[1,32], index: 8, kind: input, shape index: {}]   ;;  %s2054_s9 = inlined_call_operand.vmem [shape: bf16[32,32], index: 9, kind: input, shape index: {}]   ;;  %s2055_s10 = inlined_call_operand.vmem [shape: f32[1,32], index: 10, kind: input, shape index: {}]   ;;  %s2056_s11 = inlined_call_operand.vmem [shape: bf16[32,8], index: 11, kind: input, shape index: {}]   ;;  %s2057_s12 = inlined_call_operand.vmem [shape: f32[1,8], index: 12, kind: input, shape index: {}]   ;;  %s2058_s13 = inlined_call_operand.vmem [shape: f32[256,8], index: 13, kind: output, shape index: {}]  }
   0x1 LB: > { %s1438_s26 = sadd.s32 4294967295, %s1813_s25   ;;  %p1442_p0 = scmp.ge.s32.totalorder %s1813_s25, 1  ;;  %s1813_s25 = sphi %s1885_s25, %s23_s25  }
   0x2   : > { %p388_p1 = scmp.lt.s32.totalorder %s1813_s25, 5 }
   0x4   : > { %p389_p2 = pnand %p1442_p0, %p388_p1 }
   0x5   : > { %s1443_s29 = sshll.u32 (!%p389_p2), %s1438_s26, 3 }
   0x6   : > { %392 = sbr.rel (%p389_p2) target bundleno = 1523 (0x5f3), region = 72  ;;  %p433_p3 = scmp.lt.s32.totalorder (!%p389_p2), %s1443_s29, 31 }
   0xb   : > { %v1622_v0 = vld [vmem:[%s2046_s1] sm:$0xff]   ;;  %s2060_s29 = smov (!%p433_p3, %s1443_s29), 31  ;;  %vm472_vm0 = vcmask 130048   ;;  %v1623_v13 = vld [vmem:[%s2048_s3 + $0x8] sm:$0xff]   ;;  %vm633_vm1 = vcmask 261120   ;;  %vm1373_vm2 = vcmask 64512  }
   0xc   : > { %1554 = vmatprep.subr.bf16.mxu0 %v1622_v0  ;;  %1612 = vmatprep.subr.bf16.mxu1 %v1622_v0  ;;  %s1444_s30 = sshll.u32 %s2060_s29, 3  ;;  %v1624_v14 = vld [vmem:[%s2048_s3] sm:$0xff]  }
   0xd   : > { %1555 = vmatpush3.bf16.msra.mxu0 %v1622_v0  ;;  %1613 = vmatpush3.bf16.msra.mxu1 %v1622_v0  ;;  %s436_s16 = scalar_lea.vmem %s2045_s0, %s1444_s30  ;;  %v1447_v15 = vld [vmem:[%s2047_s2] ss:$0 sm:$0xff]  ;;  %s442_s21 = scalar_lea.vmem %s2058_s13, %s1444_s30 }
   0xe   : > { %v445_v1 = vld [vmem:[%s436_s16] sm:$0xff]  ;;  %v446_v2 = vld [vmem:[%s436_s16 + $0x8] sm:$0xff]  ;;  %v447_v6 = vld [vmem:[%s436_s16 + $0x10] sm:$0xff]  ;;  %1564 = vmatprep.subr.bf16.mxu1 %v1623_v13 }
   0xf   : > { %v449_v3 = vld [vmem:[%s436_s16 + $0x20] sm:$0xff]  ;;  %v453_v4 = vpack.c.bf16 %v446_v2, %v445_v1  ;;  %v450_v5 = vld [vmem:[%s436_s16 + $0x28] sm:$0xff]  ;;  %v448_v7 = vld [vmem:[%s436_s16 + $0x18] sm:$0xff] }
  0x10   : > { %v455_v8 = vpack.c.bf16 %v450_v5, %v449_v3  ;;  %v454_v9 = vpack.c.bf16 %v448_v7, %v447_v6  ;;  %v451_v10 = vld [vmem:[%s436_s16 + $0x30] sm:$0xff]  ;;  %v452_v11 = vld [vmem:[%s436_s16 + $0x38] sm:$0xff] }
  0x11   : > { %1556 = vmatprep.mubr.msk.bf16.mxu0 %vm472_vm0, %v453_v4  ;;  %v456_v12 = vpack.c.bf16 %v452_v11, %v451_v10 }
  0x12   : > { %1560 = vmatprep.mubr.msk.bf16.mxu1 %vm472_vm0, %v455_v8  ;;  %1557 = vmatmul.mubr.msk.bf16.vlgmr.msra.gmra.mxu0 %vm472_vm0, %v454_v9 }
  0x13   : > { %1561 = vmatmul.mubr.msk.bf16.vlgmr.msra.gmra.mxu1 %vm472_vm0, %v456_v12  ;;  %v1461_v12 = vld [vmem:[%s2049_s4] ss:$0 sm:$0xff] }
  0x14   : > { %1565 = vmatpush3.bf16.msra.mxu1 %v1623_v13 }
  0x15   : > { %1566 = vmatprep.subr.bf16.mxu1 %v1624_v14 }
  0x18   : > { %1567 = vmatpush3.bf16.msra.mxu1 %v1624_v14 }
  0xd2   : > { %v1558_v16 = vpop.f32.mrf.mxu0 }
  0xd3   : > { %v1913_v17 = vadd.f32 %v1558_v16, %v1447_v15  ;;  %v1562_v18 = vpop.f32.mrf.mxu1 }
  0xd4   : > { %v519_v19 = vpop.f32.mrf.mxu0  ;;  %v1916_v28 = vadd.f32 %v1562_v18, %v1447_v15 }
  0xd5   : > { %v1455_v20 = vmul.f32 -1.442695, %v1913_v17  ;;  %v520_v21 = vadd.f32 %v1447_v15, %v519_v19  ;;  %v535_v22 = vpop.f32.mrf.mxu1 }
  0xd6   : > { %v536_v23 = vadd.f32 %v1447_v15, %v535_v22  ;;  %v1559_v24 = vpop.f32.mrf.mxu0  ;;  %v1459_v38 = vmul.f32 -1.442695, %v1916_v28 }
  0xd7   : > { %1631 = vpow2.f32 %v1455_v20  ;;  %v1453_v25 = vmul.f32 -1.442695, %v520_v21  ;;  %v531_v26 = vadd.f32 %v1559_v24, %v1447_v15  ;;  %v1563_v27 = vpop.f32.mrf.mxu1 }
  0xd8   : > { %v1457_v29 = vmul.f32 -1.442695, %v536_v23  ;;  %v547_v30 = vadd.f32 %v1563_v27, %v1447_v15  ;;  %v522_v31 = vpop.f32.mrf.mxu0 }
  0xd9   : > { %1633 = vpow2.f32 %v1453_v25  ;;  %v1456_v32 = vmul.f32 -1.442695, %v531_v26  ;;  %v523_v33 = vadd.f32 %v1447_v15, %v522_v31  ;;  %v538_v34 = vpop.f32.mrf.mxu1 }
  0xda   : > { %1635 = vpow2.f32 %v1457_v29  ;;  %v1460_v35 = vmul.f32 -1.442695, %v547_v30  ;;  %v539_v36 = vadd.f32 %v1447_v15, %v538_v34 }
  0xdb   : > { %1637 = vpow2.f32 %v1456_v32  ;;  %v1454_v37 = vmul.f32 -1.442695, %v523_v33 }
  0xdc   : > { %1639 = vpow2.f32 %v1460_v35  ;;  %v1458_v39 = vmul.f32 -1.442695, %v539_v36 }
  0xdd   : > { %1641 = vpow2.f32 %v1454_v37 }
  0xde   : > { %1643 = vpow2.f32 %v1458_v39 }
  0xdf   : > { %1645 = vpow2.f32 %v1459_v38 }
  0xe4   : > { %v1632_v40 = vpop.eup %1631 }
  0xe5   : > { %v576_v41 = vadd.f32 1.0, %v1632_v40 }
  0xe6   : > { %v1634_v42 = vpop.eup %1633 }
  0xe7   : > { %v1636_v43 = vpop.eup %1635  ;;  %v574_v44 = vadd.f32 1.0, %v1634_v42  ;;  %1647 = vrcp.f32 %v576_v41 }
  0xe8   : > { %v1638_v45 = vpop.eup %1637  ;;  %v578_v46 = vadd.f32 1.0, %v1636_v43 }
  0xe9   : > { %v1640_v47 = vpop.eup %1639  ;;  %v577_v48 = vadd.f32 1.0, %v1638_v45  ;;  %1649 = vrcp.f32 %v574_v44 }
  0xea   : > { %v1642_v49 = vpop.eup %1641  ;;  %v581_v54 = vadd.f32 1.0, %v1640_v47 }
  0xeb   : > { %v1644_v50 = vpop.eup %1643  ;;  %1651 = vrcp.f32 %v577_v48  ;;  %v575_v51 = vadd.f32 1.0, %v1642_v49 }
  0xec   : > { %1653 = vrcp.f32 %v578_v46  ;;  %v579_v52 = vadd.f32 1.0, %v1644_v50  ;;  %v1646_v53 = vpop.eup %1645 }
  0xed   : > { %1655 = vrcp.f32 %v575_v51  ;;  %v580_v55 = vadd.f32 1.0, %v1646_v53 }
  0xee   : > { %1657 = vrcp.f32 %v579_v52 }
  0xef   : > { %1659 = vrcp.f32 %v581_v54 }
  0xf0   : > { %1661 = vrcp.f32 %v580_v55 }
  0xf4   : > { %v1648_v56 = vpop.eup %1647 }
  0xf5   : > { %v600_v1 = vmul.f32 %v1648_v56, %v1913_v17 }
  0xf6   : > { %v1650_v57 = vpop.eup %1649 }
  0xf7   : > { %v598_v63 = vmul.f32 %v1650_v57, %v520_v21 }
  0xf8   : > { %v1652_v58 = vpop.eup %1651 }
  0xf9   : > { %v1654_v59 = vpop.eup %1653  ;;  %v601_v61 = vmul.f32 %v1652_v58, %v531_v26 }
  0xfa   : > { %v1656_v60 = vpop.eup %1655  ;;  %v602_v3 = vmul.f32 %v1654_v59, %v536_v23 }
  0xfb   : > { %v1658_v62 = vpop.eup %1657  ;;  %v599_v0 = vmul.f32 %v1656_v60, %v523_v33  ;;  %v607_v5 = vpack.c.bf16 %v601_v61, %v600_v1 }
  0xfc   : > { %v603_v2 = vmul.f32 %v1658_v62, %v539_v36  ;;  %v1660_v6 = vpop.eup %1659 }
  0xfd   : > { %v606_v4 = vpack.c.bf16 %v599_v0, %v598_v63  ;;  %v1662_v8 = vpop.eup %1661  ;;  %v605_v9 = vmul.f32 %v1660_v6, %v547_v30 }
  0xfe   : > { %v608_v7 = vpack.c.bf16 %v603_v2, %v602_v3  ;;  %v604_v10 = vmul.f32 %v1662_v8, %v1916_v28 }
  0xff   : > { %1568 = vmatprep.mubr.msk.bf16.mxu1 %vm633_vm1, %v606_v4 }
 0x100   : > { %1569 = vmatmul.mubr.msk.bf16.vlgmr.msra.gmra.mxu1 %vm633_vm1, %v607_v5  ;;  %v609_v11 = vpack.c.bf16 %v605_v9, %v604_v10 }
 0x101   : > { %1572 = vmatprep.mubr.msk.bf16.mxu1 %vm633_vm1, %v608_v7 }
 0x108   : > { %1573 = vmatmul.mubr.msk.bf16.gmra.mxu1 %vm633_vm1, %v609_v11 }
 0x1c0   : > { %v1570_v13 = vpop.f32.mrf.mxu1 }
 0x1c1   : > { %v689_v14 = vadd.f32 %v1570_v13, %v1461_v12 }
 0x1c2   : > { %v680_v15 = vpop.f32.mrf.mxu1 }
 0x1c3   : > { %v1470_v16 = vmul.f32 -1.442695, %v689_v14  ;;  %v681_v17 = vadd.f32 %v1461_v12, %v680_v15 }
 0x1c4   : > { %v1571_v18 = vpop.f32.mrf.mxu1 }
 0x1c5   : > { %1663 = vpow2.f32 %v1470_v16  ;;  %v1468_v19 = vmul.f32 -1.442695, %v681_v17  ;;  %v692_v20 = vadd.f32 %v1571_v18, %v1461_v12 }
 0x1c6   : > { %v683_v21 = vpop.f32.mrf.mxu1 }
 0x1c7   : > { %1665 = vpow2.f32 %v1468_v19  ;;  %v1471_v22 = vmul.f32 -1.442695, %v692_v20  ;;  %v684_v23 = vadd.f32 %v1461_v12, %v683_v21 }
 0x1c8   : > { %v1574_v24 = vpop.f32.mrf.mxu1 }
 0x1c9   : > { %1667 = vpow2.f32 %v1471_v22  ;;  %v1469_v25 = vmul.f32 -1.442695, %v684_v23  ;;  %v705_v26 = vadd.f32 %v1574_v24, %v1461_v12 }
 0x1ca   : > { %v696_v27 = vpop.f32.mrf.mxu1 }
 0x1cb   : > { %1669 = vpow2.f32 %v1469_v25  ;;  %v1474_v28 = vmul.f32 -1.442695, %v705_v26  ;;  %v697_v29 = vadd.f32 %v1461_v12, %v696_v27 }
 0x1cc   : > { %v1575_v30 = vpop.f32.mrf.mxu1 }
 0x1cd   : > { %1671 = vpow2.f32 %v1474_v28  ;;  %v1472_v31 = vmul.f32 -1.442695, %v697_v29  ;;  %v708_v32 = vadd.f32 %v1575_v30, %v1461_v12 }
 0x1ce   : > { %v699_v33 = vpop.f32.mrf.mxu1 }
 0x1cf   : > { %1673 = vpow2.f32 %v1472_v31  ;;  %v1475_v34 = vmul.f32 -1.442695, %v708_v32  ;;  %v700_v35 = vadd.f32 %v1461_v12, %v699_v33 }
 0x1d1   : > { %1675 = vpow2.f32 %v1475_v34  ;;  %v1473_v36 = vmul.f32 -1.442695, %v700_v35 }
 0x1d2   : > { %v1664_v37 = vpop.eup %1663 }
 0x1d3   : > { %v737_v38 = vadd.f32 1.0, %v1664_v37  ;;  %1677 = vpow2.f32 %v1473_v36 }
 0x1d4   : > { %v1666_v39 = vpop.eup %1665 }
 0x1d5   : > { %1679 = vrcp.f32 %v737_v38  ;;  %v735_v40 = vadd.f32 1.0, %v1666_v39 }
 0x1d6   : > { %v1668_v41 = vpop.eup %1667 }
 0x1d7   : > { %1681 = vrcp.f32 %v735_v40  ;;  %v738_v42 = vadd.f32 1.0, %v1668_v41 }
 0x1d8   : > { %v1670_v43 = vpop.eup %1669 }
 0x1d9   : > { %1683 = vrcp.f32 %v738_v42  ;;  %v736_v44 = vadd.f32 1.0, %v1670_v43 }
 0x1da   : > { %v1672_v45 = vpop.eup %1671 }
 0x1db   : > { %1685 = vrcp.f32 %v736_v44  ;;  %v741_v46 = vadd.f32 1.0, %v1672_v45 }
 0x1dc   : > { %v1674_v47 = vpop.eup %1673 }
 0x1dd   : > { %v739_v48 = vadd.f32 1.0, %v1674_v47  ;;  %1687 = vrcp.f32 %v741_v46 }
 0x1de   : > { %v1676_v49 = vpop.eup %1675 }
 0x1df   : > { %1689 = vrcp.f32 %v739_v48  ;;  %v742_v50 = vadd.f32 1.0, %v1676_v49 }
 0x1e0   : > { %v1678_v51 = vpop.eup %1677 }
 0x1e1   : > { %v740_v52 = vadd.f32 1.0, %v1678_v51  ;;  %1691 = vrcp.f32 %v742_v50 }
 0x1e2   : > { %v1680_v53 = vpop.eup %1679 }
 0x1e3   : > { %1693 = vrcp.f32 %v740_v52  ;;  %v761_v54 = vmul.f32 %v1680_v53, %v689_v14  ;;  %v1625_v53 = vld [vmem:[%s2052_s7 + $0x8] sm:$0xff]  }
 0x1e4   : > { %v1682_v55 = vpop.eup %1681  ;;  %1576 = vmatprep.subr.bf16.mxu0 %v1625_v53 }
 0x1e5   : > { %v773_v56 = vsel %vm633_vm1, %v761_v54, 0.0  ;;  %v759_v57 = vmul.f32 %v1682_v55, %v681_v17  ;;  %1577 = vmatpush3.bf16.msra.mxu0 %v1625_v53 }
 0x1e6   : > { %v1684_v58 = vpop.eup %1683  ;;  %774 = vadd.xlane.f32.xlu1 %v773_v56 }
 0x1e7   : > { %v767_v59 = vsel %vm633_vm1, %v759_v57, 0.0  ;;  %v762_v60 = vmul.f32 %v1684_v58, %v692_v20 }
 0x1e8   : > { %v1686_v61 = vpop.eup %1685  ;;  %768 = vadd.xlane.f32.xlu0 %v767_v59 }
 0x1e9   : > { %v776_v62 = vsel %vm633_vm1, %v762_v60, 0.0  ;;  %v760_v63 = vmul.f32 %v1686_v61, %v684_v23 }
 0x1ea   : > { %777 = vadd.xlane.f32.xlu1 %v776_v62  ;;  %v1688_v0 = vpop.eup %1687 }
 0x1eb   : > { %v770_v1 = vsel %vm633_vm1, %v760_v63, 0.0  ;;  %v765_v6 = vmul.f32 %v1688_v0, %v705_v26 }
 0x1ec   : > { %v1690_v2 = vpop.eup %1689  ;;  %771 = vadd.xlane.f32.xlu0 %v770_v1 }
 0x1ed   : > { %v763_v3 = vmul.f32 %v1690_v2, %v697_v29  ;;  %v785_v10 = vsel %vm633_vm1, %v765_v6, 0.0 }
 0x1ee   : > { %v1692_v4 = vpop.eup %1691 }
 0x1ef   : > { %v779_v5 = vsel %vm633_vm1, %v763_v3, 0.0  ;;  %v766_v11 = vmul.f32 %v1692_v4, %v708_v32 }
 0x1f0   : > { %v1694_v7 = vpop.eup %1693  ;;  %780 = vadd.xlane.f32.xlu0 %v779_v5 }
 0x1f1   : > { %v764_v8 = vmul.f32 %v1694_v7, %v700_v35  ;;  %v788_v12 = vsel %vm633_vm1, %v766_v11, 0.0 }
 0x1f3   : > { %v782_v9 = vsel %vm633_vm1, %v764_v8, 0.0 }
 0x1f4   : > { %783 = vadd.xlane.f32.xlu1 %v782_v9  ;;  %786 = vadd.xlane.f32.xlu0 %v785_v10 }
 0x1f8   : > { %789 = vadd.xlane.f32.xlu1 %v788_v12 }
 0x26f   : > { %v775_v13 = vpop.xlane.xlu1 %774 }
 0x270   : > { %v793_v14 = vmul.f32 0.03125, %v775_v13 }
 0x271   : > { %v769_v15 = vpop.xlane.xlu0 %768 }
 0x272   : > { %v791_v16 = vmul.f32 0.03125, %v769_v15  ;;  %v1936_v18 = vsub.f32 %v761_v54, %v793_v14  ;;  %v1626_v54 = vld [vmem:[%s2052_s7] sm:$0xff]  }
 0x273   : > { %v778_v17 = vpop.xlane.xlu1 %777  ;;  %1578 = vmatprep.subr.bf16.mxu0 %v1626_v54 }
 0x274   : > { %v1938_v19 = vsub.f32 %v759_v57, %v791_v16  ;;  %v794_v20 = vmul.f32 0.03125, %v778_v17  ;;  %v809_v27 = vmul.f32 %v1936_v18, %v1936_v18  ;;  %1579 = vmatpush3.bf16.msra.mxu0 %v1626_v54  ;;  %v1476_v17 = vld [vmem:[%s2050_s5] ss:$0 sm:$0xff] }
 0x275   : > { %v772_v21 = vpop.xlane.xlu0 %771 }
 0x276   : > { %v792_v22 = vmul.f32 0.03125, %v772_v21  ;;  %v807_v23 = vmul.f32 %v1938_v19, %v1938_v19  ;;  %v1942_v24 = vsub.f32 %v762_v60, %v794_v20  ;;  %v821_v32 = vsel %vm633_vm1, %v809_v27, 0.0  ;;  %v1477_v27 = vld [vmem:[%s2051_s6] ss:$0 sm:$0xff] }
 0x278   : > { %v1944_v25 = vsub.f32 %v760_v63, %v792_v22  ;;  %v815_v26 = vsel %vm633_vm1, %v807_v23, 0.0  ;;  %v810_v34 = vmul.f32 %v1942_v24, %v1942_v24 }
 0x279   : > { %816 = vadd.xlane.f32.xlu0 %v815_v26  ;;  %v781_v28 = vpop.xlane.xlu0 %780 }
 0x27a   : > { %v795_v29 = vmul.f32 0.03125, %v781_v28  ;;  %v808_v30 = vmul.f32 %v1944_v25, %v1944_v25  ;;  %v824_v42 = vsel %vm633_vm1, %v810_v34, 0.0 }
 0x27c   : > { %v1951_v31 = vsub.f32 %v763_v3, %v795_v29  ;;  %v818_v33 = vsel %vm633_vm1, %v808_v30, 0.0 }
 0x27d   : > { %v784_v35 = vpop.xlane.xlu1 %783  ;;  %822 = vadd.xlane.f32.xlu0 %v821_v32  ;;  %819 = vadd.xlane.f32.xlu1 %v818_v33  ;;  %v787_v36 = vpop.xlane.xlu0 %786 }
 0x27e   : > { %v796_v37 = vmul.f32 0.03125, %v784_v35  ;;  %v797_v38 = vmul.f32 0.03125, %v787_v36  ;;  %v811_v39 = vmul.f32 %v1951_v31, %v1951_v31 }
 0x280   : > { %v1959_v40 = vsub.f32 %v764_v8, %v796_v37  ;;  %v1961_v41 = vsub.f32 %v765_v6, %v797_v38  ;;  %v827_v43 = vsel %vm633_vm1, %v811_v39, 0.0 }
 0x281   : > { %v790_v44 = vpop.xlane.xlu1 %789  ;;  %825 = vadd.xlane.f32.xlu1 %v824_v42  ;;  %828 = vadd.xlane.f32.xlu0 %v827_v43 }
 0x282   : > { %v798_v45 = vmul.f32 0.03125, %v790_v44  ;;  %v812_v46 = vmul.f32 %v1959_v40, %v1959_v40  ;;  %v813_v47 = vmul.f32 %v1961_v41, %v1961_v41 }
 0x284   : > { %v1969_v48 = vsub.f32 %v766_v11, %v798_v45  ;;  %v830_v49 = vsel %vm633_vm1, %v812_v46, 0.0  ;;  %v833_v50 = vsel %vm633_vm1, %v813_v47, 0.0 }
 0x285   : > { %831 = vadd.xlane.f32.xlu1 %v830_v49  ;;  %834 = vadd.xlane.f32.xlu0 %v833_v50 }
 0x286   : > { %v814_v51 = vmul.f32 %v1969_v48, %v1969_v48 }
 0x288   : > { %v836_v52 = vsel %vm633_vm1, %v814_v51, 0.0 }
 0x289   : > { %837 = vadd.xlane.f32.xlu1 %v836_v52 }
 0x302   : > { %v817_v55 = vpop.xlane.xlu0 %816 }
 0x303   : > { %v839_v56 = vmul.f32 0.03125, %v817_v55  ;;  %v1478_v55 = vld [vmem:[%s2053_s8] ss:$0 sm:$0xff] }
 0x305   : > { %v847_v57 = vadd.f32 1e-05, %v839_v56 }
 0x306   : > { %v820_v58 = vpop.xlane.xlu1 %819  ;;  %v823_v59 = vpop.xlane.xlu0 %822 }
 0x307   : > { %1695 = vrsqrt.f32 %v847_v57  ;;  %v840_v60 = vmul.f32 0.03125, %v820_v58  ;;  %v841_v61 = vmul.f32 0.03125, %v823_v59 }
 0x309   : > { %v848_v62 = vadd.f32 1e-05, %v840_v60  ;;  %v849_v63 = vadd.f32 1e-05, %v841_v61 }
 0x30a   : > { %v826_v0 = vpop.xlane.xlu1 %825  ;;  %v829_v1 = vpop.xlane.xlu0 %828 }
 0x30b   : > { %1697 = vrsqrt.f32 %v848_v62  ;;  %v842_v2 = vmul.f32 0.03125, %v826_v0  ;;  %v843_v3 = vmul.f32 0.03125, %v829_v1 }
 0x30c   : > { %1699 = vrsqrt.f32 %v849_v63 }
 0x30d   : > { %v850_v4 = vadd.f32 1e-05, %v842_v2  ;;  %v851_v5 = vadd.f32 1e-05, %v843_v3 }
 0x30e   : > { %v832_v6 = vpop.xlane.xlu1 %831  ;;  %v835_v7 = vpop.xlane.xlu0 %834 }
 0x30f   : > { %1701 = vrsqrt.f32 %v850_v4  ;;  %v844_v8 = vmul.f32 0.03125, %v832_v6  ;;  %v845_v9 = vmul.f32 0.03125, %v835_v7 }
 0x310   : > { %1703 = vrsqrt.f32 %v851_v5 }
 0x311   : > { %v852_v10 = vadd.f32 1e-05, %v844_v8  ;;  %v853_v11 = vadd.f32 1e-05, %v845_v9 }
 0x312   : > { %v838_v12 = vpop.xlane.xlu1 %837 }
 0x313   : > { %1705 = vrsqrt.f32 %v852_v10  ;;  %v846_v13 = vmul.f32 0.03125, %v838_v12 }
 0x314   : > { %v1696_v14 = vpop.eup %1695  ;;  %1707 = vrsqrt.f32 %v853_v11 }
 0x315   : > { %v854_v15 = vadd.f32 1e-05, %v846_v13  ;;  %v863_v16 = vmul.f32 %v1696_v14, %v1938_v19 }
 0x317   : > { %1709 = vrsqrt.f32 %v854_v15  ;;  %v878_v23 = vmul.f32 %v1476_v17, %v863_v16 }
 0x318   : > { %v1698_v20 = vpop.eup %1697 }
 0x319   : > { %v1700_v21 = vpop.eup %1699  ;;  %v864_v22 = vmul.f32 %v1698_v20, %v1944_v25  ;;  %v893_v32 = vadd.f32 %v1477_v27, %v878_v23 }
 0x31a   : > { %v865_v26 = vmul.f32 %v1700_v21, %v1936_v18 }
 0x31b   : > { %v879_v28 = vmul.f32 %v1476_v17, %v864_v22 }
 0x31c   : > { %v1702_v29 = vpop.eup %1701  ;;  %v880_v34 = vmul.f32 %v1476_v17, %v865_v26 }
 0x31d   : > { %v1704_v30 = vpop.eup %1703  ;;  %v866_v19 = vmul.f32 %v1702_v29, %v1942_v24  ;;  %v894_v33 = vadd.f32 %v1477_v27, %v879_v28 }
 0x31e   : > { %v867_v35 = vmul.f32 %v1704_v30, %v1951_v31  ;;  %v895_v18 = vadd.f32 %v1477_v27, %v880_v34 }
 0x31f   : > { %v901_v36 = vpack.c.bf16 %v894_v33, %v893_v32  ;;  %v881_v37 = vmul.f32 %v1476_v17, %v866_v19 }
 0x320   : > { %v1706_v25 = vpop.eup %1705  ;;  %v882_v43 = vmul.f32 %v1476_v17, %v867_v35 }
 0x321   : > { %v1708_v38 = vpop.eup %1707  ;;  %1580 = vmatprep.mubr.msk.bf16.mxu0 %vm633_vm1, %v901_v36  ;;  %v896_v39 = vadd.f32 %v1477_v27, %v881_v37  ;;  %v868_v42 = vmul.f32 %v1706_v25, %v1959_v40 }
 0x322   : > { %v869_v44 = vmul.f32 %v1708_v38, %v1961_v41  ;;  %v897_v47 = vadd.f32 %v1477_v27, %v882_v43  ;;  %v1627_v41 = vld [vmem:[%s2054_s9 + $0x8] sm:$0xff]  }
 0x323   : > { %v902_v45 = vpack.c.bf16 %v896_v39, %v895_v18  ;;  %v883_v24 = vmul.f32 %v1476_v17, %v868_v42  ;;  %1588 = vmatprep.subr.bf16.mxu1 %v1627_v41 }
 0x324   : > { %v1710_v46 = vpop.eup %1709  ;;  %v884_v50 = vmul.f32 %v1476_v17, %v869_v44  ;;  %1589 = vmatpush3.bf16.msra.mxu1 %v1627_v41  ;;  %v1630_v41 = vld [vmem:[%s2056_s11] sm:$0xff]  }
 0x325   : > { %1581 = vmatmul.mubr.msk.bf16.vlgmr.msra.gmra.mxu0 %vm633_vm1, %v902_v45  ;;  %v898_v31 = vadd.f32 %v1477_v27, %v883_v24  ;;  %v870_v49 = vmul.f32 %v1710_v46, %v1969_v48  ;;  %v1628_v48 = vld [vmem:[%s2054_s9] sm:$0xff]  }
 0x326   : > { %v899_v53 = vadd.f32 %v1477_v27, %v884_v50  ;;  %1590 = vmatprep.subr.bf16.mxu1 %v1628_v48 }
 0x327   : > { %v903_v51 = vpack.c.bf16 %v898_v31, %v897_v47  ;;  %v885_v52 = vmul.f32 %v1476_v17, %v870_v49 }
 0x328   : > { %1591 = vmatpush3.bf16.msra.mxu1 %v1628_v48  ;;  %v1493_v48 = vld [vmem:[%s2055_s10] ss:$0 sm:$0xff] }
 0x329   : > { %1584 = vmatprep.mubr.msk.bf16.mxu0 %vm633_vm1, %v903_v51  ;;  %v900_v54 = vadd.f32 %v1477_v27, %v885_v52 }
 0x32b   : > { %v904_v40 = vpack.c.bf16 %v900_v54, %v899_v53 }
 0x32d   : > { %1585 = vmatmul.mubr.msk.bf16.gmra.mxu0 %vm633_vm1, %v904_v40  ;;  %v1629_v40 = vld [vmem:[%s2056_s11 + $0x8] sm:$0xff]  }
 0x32e   : > { %1600 = vmatprep.subr.bf16.mxu0 %v1629_v40 }
 0x32f   : > { %1601 = vmatpush3.bf16.msra.mxu0 %v1629_v40 }
 0x330   : > { %1602 = vmatprep.subr.bf16.mxu0 %v1630_v41 }
 0x333   : > { %1603 = vmatpush3.bf16.msra.mxu0 %v1630_v41 }
 0x3e5   : > { %v1582_v56 = vpop.f32.mrf.mxu0 }
 0x3e6   : > { %v983_v57 = vadd.f32 %v1582_v56, %v1478_v55 }
 0x3e7   : > { %v974_v58 = vpop.f32.mrf.mxu0 }
 0x3e8   : > { %v1487_v59 = vmul.f32 -1.442695, %v983_v57  ;;  %v975_v60 = vadd.f32 %v1478_v55, %v974_v58 }
 0x3e9   : > { %v1583_v61 = vpop.f32.mrf.mxu0 }
 0x3ea   : > { %v1485_v62 = vmul.f32 -1.442695, %v975_v60  ;;  %v986_v63 = vadd.f32 %v1583_v61, %v1478_v55  ;;  %1711 = vpow2.f32 %v1487_v59 }
 0x3eb   : > { %v977_v0 = vpop.f32.mrf.mxu0 }
 0x3ec   : > { %1713 = vpow2.f32 %v1485_v62  ;;  %v1488_v1 = vmul.f32 -1.442695, %v986_v63  ;;  %v978_v2 = vadd.f32 %v1478_v55, %v977_v0 }
 0x3ed   : > { %v1586_v3 = vpop.f32.mrf.mxu0 }
 0x3ee   : > { %1715 = vpow2.f32 %v1488_v1  ;;  %v1486_v4 = vmul.f32 -1.442695, %v978_v2  ;;  %v999_v5 = vadd.f32 %v1586_v3, %v1478_v55 }
 0x3ef   : > { %v990_v6 = vpop.f32.mrf.mxu0 }
 0x3f0   : > { %1717 = vpow2.f32 %v1486_v4  ;;  %v1491_v7 = vmul.f32 -1.442695, %v999_v5  ;;  %v991_v8 = vadd.f32 %v1478_v55, %v990_v6 }
 0x3f1   : > { %v1587_v9 = vpop.f32.mrf.mxu0 }
 0x3f2   : > { %v1489_v10 = vmul.f32 -1.442695, %v991_v8  ;;  %v1002_v11 = vadd.f32 %v1587_v9, %v1478_v55  ;;  %1719 = vpow2.f32 %v1491_v7 }
 0x3f3   : > { %v993_v12 = vpop.f32.mrf.mxu0 }
 0x3f4   : > { %1721 = vpow2.f32 %v1489_v10  ;;  %v1492_v13 = vmul.f32 -1.442695, %v1002_v11  ;;  %v994_v14 = vadd.f32 %v1478_v55, %v993_v12 }
 0x3f6   : > { %1723 = vpow2.f32 %v1492_v13  ;;  %v1490_v15 = vmul.f32 -1.442695, %v994_v14 }
 0x3f7   : > { %v1712_v16 = vpop.eup %1711 }
 0x3f8   : > { %1725 = vpow2.f32 %v1490_v15  ;;  %v1031_v22 = vadd.f32 1.0, %v1712_v16 }
 0x3f9   : > { %v1714_v17 = vpop.eup %1713 }
 0x3fa   : > { %v1029_v20 = vadd.f32 1.0, %v1714_v17 }
 0x3fb   : > { %v1716_v21 = vpop.eup %1715 }
 0x3fc   : > { %v1032_v23 = vadd.f32 1.0, %v1716_v21  ;;  %1727 = vrcp.f32 %v1029_v20 }
 0x3fd   : > { %v1718_v26 = vpop.eup %1717 }
 0x3fe   : > { %1729 = vrcp.f32 %v1032_v23  ;;  %v1030_v27 = vadd.f32 1.0, %v1718_v26 }
 0x3ff   : > { %1731 = vrcp.f32 %v1031_v22  ;;  %v1720_v28 = vpop.eup %1719 }
 0x400   : > { %1733 = vrcp.f32 %v1030_v27  ;;  %v1035_v32 = vadd.f32 1.0, %v1720_v28 }
 0x401   : > { %v1722_v29 = vpop.eup %1721 }
 0x402   : > { %v1033_v30 = vadd.f32 1.0, %v1722_v29 }
 0x403   : > { %v1724_v19 = vpop.eup %1723 }
 0x404   : > { %v1036_v33 = vadd.f32 1.0, %v1724_v19  ;;  %1735 = vrcp.f32 %v1033_v30 }
 0x405   : > { %v1726_v34 = vpop.eup %1725 }
 0x406   : > { %1737 = vrcp.f32 %v1036_v33  ;;  %v1034_v35 = vadd.f32 1.0, %v1726_v34 }
 0x407   : > { %1739 = vrcp.f32 %v1035_v32 }
 0x408   : > { %1741 = vrcp.f32 %v1034_v35 }
 0x409   : > { %v1728_v36 = vpop.eup %1727 }
 0x40a   : > { %v1053_v39 = vmul.f32 %v1728_v36, %v975_v60 }
 0x40b   : > { %v1730_v37 = vpop.eup %1729 }
 0x40c   : > { %v1732_v25 = vpop.eup %1731  ;;  %v1056_v18 = vmul.f32 %v1730_v37, %v986_v63 }
 0x40d   : > { %v1734_v38 = vpop.eup %1733  ;;  %v1055_v43 = vmul.f32 %v1732_v25, %v983_v57 }
 0x40e   : > { %v1054_v42 = vmul.f32 %v1734_v38, %v978_v2 }
 0x40f   : > { %v1062_v45 = vpack.c.bf16 %v1056_v18, %v1055_v43 }
 0x410   : > { %v1061_v44 = vpack.c.bf16 %v1054_v42, %v1053_v39 }
 0x411   : > { %v1736_v24 = vpop.eup %1735 }
 0x412   : > { %1592 = vmatprep.mubr.msk.bf16.mxu1 %vm633_vm1, %v1061_v44  ;;  %v1057_v50 = vmul.f32 %v1736_v24, %v991_v8 }
 0x413   : > { %v1738_v46 = vpop.eup %1737  ;;  %1593 = vmatmul.mubr.msk.bf16.vlgmr.msra.gmra.mxu1 %vm633_vm1, %v1062_v45 }
 0x414   : > { %v1740_v47 = vpop.eup %1739  ;;  %v1060_v49 = vmul.f32 %v1738_v46, %v1002_v11 }
 0x415   : > { %v1742_v31 = vpop.eup %1741  ;;  %v1059_v52 = vmul.f32 %v1740_v47, %v999_v5 }
 0x416   : > { %v1058_v51 = vmul.f32 %v1742_v31, %v994_v14 }
 0x417   : > { %v1064_v54 = vpack.c.bf16 %v1060_v49, %v1059_v52 }
 0x418   : > { %v1063_v53 = vpack.c.bf16 %v1058_v51, %v1057_v50 }
 0x41a   : > { %1596 = vmatprep.mubr.msk.bf16.mxu1 %vm633_vm1, %v1063_v53 }
 0x41b   : > { %1597 = vmatmul.mubr.msk.bf16.gmra.mxu1 %vm633_vm1, %v1064_v54  ;;  %v1508_v54 = vld [vmem:[%s2057_s12] ss:$0 sm:$0xff] }
 0x4d3   : > { %v1594_v55 = vpop.f32.mrf.mxu1 }
 0x4d4   : > { %v1143_v56 = vadd.f32 %v1594_v55, %v1493_v48 }
 0x4d5   : > { %v1134_v57 = vpop.f32.mrf.mxu1 }
 0x4d6   : > { %v1502_v58 = vmul.f32 -1.442695, %v1143_v56  ;;  %v1135_v59 = vadd.f32 %v1493_v48, %v1134_v57 }
 0x4d7   : > { %v1595_v60 = vpop.f32.mrf.mxu1 }
 0x4d8   : > { %v1500_v61 = vmul.f32 -1.442695, %v1135_v59  ;;  %v1146_v62 = vadd.f32 %v1595_v60, %v1493_v48  ;;  %1743 = vpow2.f32 %v1502_v58 }
 0x4d9   : > { %v1137_v63 = vpop.f32.mrf.mxu1 }
 0x4da   : > { %1745 = vpow2.f32 %v1500_v61  ;;  %v1503_v0 = vmul.f32 -1.442695, %v1146_v62  ;;  %v1138_v1 = vadd.f32 %v1493_v48, %v1137_v63 }
 0x4db   : > { %v1598_v2 = vpop.f32.mrf.mxu1 }
 0x4dc   : > { %1747 = vpow2.f32 %v1503_v0  ;;  %v1501_v3 = vmul.f32 -1.442695, %v1138_v1  ;;  %v1159_v4 = vadd.f32 %v1598_v2, %v1493_v48 }
 0x4dd   : > { %v1150_v5 = vpop.f32.mrf.mxu1 }
 0x4de   : > { %1749 = vpow2.f32 %v1501_v3  ;;  %v1506_v6 = vmul.f32 -1.442695, %v1159_v4  ;;  %v1151_v7 = vadd.f32 %v1493_v48, %v1150_v5 }
 0x4df   : > { %v1599_v8 = vpop.f32.mrf.mxu1 }
 0x4e0   : > { %v1504_v9 = vmul.f32 -1.442695, %v1151_v7  ;;  %v1162_v10 = vadd.f32 %v1599_v8, %v1493_v48  ;;  %1751 = vpow2.f32 %v1506_v6 }
 0x4e1   : > { %v1153_v11 = vpop.f32.mrf.mxu1 }
 0x4e2   : > { %1753 = vpow2.f32 %v1504_v9  ;;  %v1507_v12 = vmul.f32 -1.442695, %v1162_v10  ;;  %v1154_v13 = vadd.f32 %v1493_v48, %v1153_v11 }
 0x4e4   : > { %1755 = vpow2.f32 %v1507_v12  ;;  %v1505_v14 = vmul.f32 -1.442695, %v1154_v13 }
 0x4e5   : > { %v1744_v15 = vpop.eup %1743 }
 0x4e6   : > { %1757 = vpow2.f32 %v1505_v14  ;;  %v1191_v21 = vadd.f32 1.0, %v1744_v15 }
 0x4e7   : > { %v1746_v16 = vpop.eup %1745 }
 0x4e8   : > { %v1189_v17 = vadd.f32 1.0, %v1746_v16 }
 0x4e9   : > { %v1748_v20 = vpop.eup %1747 }
 0x4ea   : > { %v1192_v22 = vadd.f32 1.0, %v1748_v20  ;;  %1759 = vrcp.f32 %v1189_v17 }
 0x4eb   : > { %v1750_v23 = vpop.eup %1749 }
 0x4ec   : > { %1761 = vrcp.f32 %v1192_v22  ;;  %v1190_v26 = vadd.f32 1.0, %v1750_v23 }
 0x4ed   : > { %1763 = vrcp.f32 %v1191_v21  ;;  %v1752_v27 = vpop.eup %1751 }
 0x4ee   : > { %1765 = vrcp.f32 %v1190_v26  ;;  %v1195_v19 = vadd.f32 1.0, %v1752_v27 }
 0x4ef   : > { %v1754_v28 = vpop.eup %1753 }
 0x4f0   : > { %v1193_v29 = vadd.f32 1.0, %v1754_v28 }
 0x4f1   : > { %v1756_v30 = vpop.eup %1755 }
 0x4f2   : > { %v1196_v32 = vadd.f32 1.0, %v1756_v30  ;;  %1767 = vrcp.f32 %v1193_v29 }
 0x4f3   : > { %v1758_v33 = vpop.eup %1757 }
 0x4f4   : > { %1769 = vrcp.f32 %v1196_v32  ;;  %v1194_v34 = vadd.f32 1.0, %v1758_v33 }
 0x4f5   : > { %1771 = vrcp.f32 %v1195_v19 }
 0x4f6   : > { %1773 = vrcp.f32 %v1194_v34 }
 0x4f7   : > { %v1760_v35 = vpop.eup %1759 }
 0x4f8   : > { %v1213_v18 = vmul.f32 %v1760_v35, %v1135_v59 }
 0x4f9   : > { %v1762_v36 = vpop.eup %1761 }
 0x4fa   : > { %v1764_v37 = vpop.eup %1763  ;;  %v1216_v38 = vmul.f32 %v1762_v36, %v1146_v62 }
 0x4fb   : > { %v1766_v25 = vpop.eup %1765  ;;  %v1215_v42 = vmul.f32 %v1764_v37, %v1143_v56 }
 0x4fc   : > { %v1214_v39 = vmul.f32 %v1766_v25, %v1138_v1 }
 0x4fd   : > { %v1222_v44 = vpack.c.bf16 %v1216_v38, %v1215_v42 }
 0x4fe   : > { %v1221_v43 = vpack.c.bf16 %v1214_v39, %v1213_v18 }
 0x4ff   : > { %v1768_v45 = vpop.eup %1767 }
 0x500   : > { %1604 = vmatprep.mubr.msk.bf16.mxu0 %vm633_vm1, %v1221_v43  ;;  %v1217_v49 = vmul.f32 %v1768_v45, %v1151_v7 }
 0x501   : > { %v1770_v24 = vpop.eup %1769  ;;  %1605 = vmatmul.mubr.msk.bf16.vlgmr.msra.gmra.mxu0 %vm633_vm1, %v1222_v44 }
 0x502   : > { %v1772_v46 = vpop.eup %1771  ;;  %v1220_v31 = vmul.f32 %v1770_v24, %v1162_v10 }
 0x503   : > { %v1774_v47 = vpop.eup %1773  ;;  %v1219_v51 = vmul.f32 %v1772_v46, %v1159_v4 }
 0x504   : > { %v1218_v50 = vmul.f32 %v1774_v47, %v1154_v13 }
 0x505   : > { %v1224_v53 = vpack.c.bf16 %v1220_v31, %v1219_v51 }
 0x506   : > { %v1223_v52 = vpack.c.bf16 %v1218_v50, %v1217_v49 }
 0x508   : > { %1608 = vmatprep.mubr.msk.bf16.mxu0 %vm633_vm1, %v1223_v52 }
 0x509   : > { %1609 = vmatmul.mubr.msk.bf16.gmra.mxu0 %vm633_vm1, %v1224_v53 }
 0x5c1   : > { %v1606_v40 = vpop.f32.mrf.mxu0 }
 0x5c2   : > { %v1303_v41 = vadd.f32 %v1606_v40, %v1508_v54 }
 0x5c3   : > { %v1294_v48 = vpop.f32.mrf.mxu0 }
 0x5c4   : > { %v1517_v55 = vmul.f32 -1.442695, %v1303_v41  ;;  %v1295_v56 = vadd.f32 %v1508_v54, %v1294_v48 }
 0x5c5   : > { %v1607_v57 = vpop.f32.mrf.mxu0 }
 0x5c6   : > { %1775 = vpow2.f32 %v1517_v55  ;;  %v1515_v58 = vmul.f32 -1.442695, %v1295_v56  ;;  %v1306_v59 = vadd.f32 %v1607_v57, %v1508_v54 }
 0x5c7   : > { %v1297_v60 = vpop.f32.mrf.mxu0 }
 0x5c8   : > { %1777 = vpow2.f32 %v1515_v58  ;;  %v1518_v61 = vmul.f32 -1.442695, %v1306_v59  ;;  %v1298_v62 = vadd.f32 %v1508_v54, %v1297_v60 }
 0x5c9   : > { %v1610_v63 = vpop.f32.mrf.mxu0 }
 0x5ca   : > { %1779 = vpow2.f32 %v1518_v61  ;;  %v1516_v0 = vmul.f32 -1.442695, %v1298_v62  ;;  %v1319_v1 = vadd.f32 %v1610_v63, %v1508_v54 }
 0x5cb   : > { %v1310_v2 = vpop.f32.mrf.mxu0 }
 0x5cc   : > { %1781 = vpow2.f32 %v1516_v0  ;;  %v1521_v3 = vmul.f32 -1.442695, %v1319_v1  ;;  %v1311_v4 = vadd.f32 %v1508_v54, %v1310_v2 }
 0x5cd   : > { %v1611_v5 = vpop.f32.mrf.mxu0 }
 0x5ce   : > { %1783 = vpow2.f32 %v1521_v3  ;;  %v1519_v6 = vmul.f32 -1.442695, %v1311_v4  ;;  %v1322_v7 = vadd.f32 %v1611_v5, %v1508_v54 }
 0x5cf   : > { %v1313_v8 = vpop.f32.mrf.mxu0 }
 0x5d0   : > { %1785 = vpow2.f32 %v1519_v6  ;;  %v1522_v9 = vmul.f32 -1.442695, %v1322_v7  ;;  %v1314_v10 = vadd.f32 %v1508_v54, %v1313_v8 }
 0x5d2   : > { %1787 = vpow2.f32 %v1522_v9  ;;  %v1520_v11 = vmul.f32 -1.442695, %v1314_v10 }
 0x5d3   : > { %v1776_v12 = vpop.eup %1775 }
 0x5d4   : > { %v1351_v13 = vadd.f32 1.0, %v1776_v12  ;;  %1789 = vpow2.f32 %v1520_v11 }
 0x5d5   : > { %v1778_v14 = vpop.eup %1777 }
 0x5d6   : > { %1791 = vrcp.f32 %v1351_v13  ;;  %v1349_v15 = vadd.f32 1.0, %v1778_v14 }
 0x5d7   : > { %v1780_v16 = vpop.eup %1779 }
 0x5d8   : > { %1793 = vrcp.f32 %v1349_v15  ;;  %v1352_v17 = vadd.f32 1.0, %v1780_v16 }
 0x5d9   : > { %v1782_v20 = vpop.eup %1781 }
 0x5da   : > { %1795 = vrcp.f32 %v1352_v17  ;;  %v1350_v21 = vadd.f32 1.0, %v1782_v20 }
 0x5db   : > { %v1784_v22 = vpop.eup %1783 }
 0x5dc   : > { %1797 = vrcp.f32 %v1350_v21  ;;  %v1355_v23 = vadd.f32 1.0, %v1784_v22 }
 0x5dd   : > { %v1786_v26 = vpop.eup %1785 }
 0x5de   : > { %1799 = vrcp.f32 %v1355_v23  ;;  %v1353_v27 = vadd.f32 1.0, %v1786_v26 }
 0x5df   : > { %v1788_v28 = vpop.eup %1787 }
 0x5e0   : > { %1801 = vrcp.f32 %v1353_v27  ;;  %v1356_v29 = vadd.f32 1.0, %v1788_v28 }
 0x5e1   : > { %v1790_v30 = vpop.eup %1789 }
 0x5e2   : > { %1803 = vrcp.f32 %v1356_v29  ;;  %v1354_v19 = vadd.f32 1.0, %v1790_v30 }
 0x5e3   : > { %v1792_v32 = vpop.eup %1791 }
 0x5e4   : > { %1376 = vst.msk [vmem:[%s442_s21 + $0x10] sm:$0xff] %vm1373_vm2, %v1792_v32  ;;  %1805 = vrcp.f32 %v1354_v19 }
 0x5e5   : > { %v1794_v33 = vpop.eup %1793 }
 0x5e6   : > { %1374 = vst.msk [vmem:[%s442_s21] sm:$0xff] %vm1373_vm2, %v1794_v33 }
 0x5e7   : > { %v1796_v34 = vpop.eup %1795 }
 0x5e8   : > { %1377 = vst.msk [vmem:[%s442_s21 + $0x18] sm:$0xff] %vm1373_vm2, %v1796_v34 }
 0x5e9   : > { %v1798_v35 = vpop.eup %1797 }
 0x5ea   : > { %1375 = vst.msk [vmem:[%s442_s21 + $0x8] sm:$0xff] %vm1373_vm2, %v1798_v35 }
 0x5eb   : > { %v1800_v36 = vpop.eup %1799 }
 0x5ec   : > { %1380 = vst.msk [vmem:[%s442_s21 + $0x30] sm:$0xff] %vm1373_vm2, %v1800_v36 }
 0x5ed   : > { %v1802_v37 = vpop.eup %1801 }
 0x5ee   : > { %1378 = vst.msk [vmem:[%s442_s21 + $0x20] sm:$0xff] %vm1373_vm2, %v1802_v37 }
 0x5ef   : > { %v1804_v25 = vpop.eup %1803 }
 0x5f0   : > { %1381 = vst.msk [vmem:[%s442_s21 + $0x38] sm:$0xff] %vm1373_vm2, %v1804_v25 }
 0x5f1   : > { %v1806_v38 = vpop.eup %1805 }
 0x5f2   : > { %1379 = vst.msk [vmem:[%s442_s21 + $0x28] sm:$0xff] %vm1373_vm2, %v1806_v38 }
 0x5f3 PF: > { %s23_s25 = sadd.s32 1, %s1813_s25  }
 0x5f4   : > { %p20_p4 = scmp.ge.s32.totalorder %s23_s25, 6  }
 0x5f6   :  { %22 = sbr.rel (!%p20_p4) target bundleno = 1 (0x1), region = 102 }

</bundles_post_ra>
